<compile_context>
chip_gen: v5e
topology: v5e:2x2
jax: 0.10.0
libtpu: 0.0.40
codegen_flags: <defaults>
</compile_context>

<pallas_src>
import jax
import jax.numpy as jnp
from jax.experimental import pallas as pl
from jax.experimental.pallas import tpu as pltpu


def _band_matrix(n, r, dtype):
    """(n, n) 0/1 matrix with ones on the band |i - j| <= r (exact in bf16)."""
    idx = jnp.arange(n)
    return (jnp.abs(idx[:, None] - idx[None, :]) <= r).astype(dtype)


def _box_filter_kernel(x_ref, bh_ref, bw_ref, o_ref):
    """One row-tile of one (channel, batch) image.

    x_ref : (H, W)        full single-channel image (invariant over row tiles)
    bh_ref: (tile_h, H)   rows of the H-direction clamped box-sum operator
    bw_ref: (W, W)        W-direction clamped box-sum operator
    o_ref : (tile_h, W)   output rows
    """
    # H-direction box sum (== diff_x(cumsum_H(x), r)) for this row tile.
    y = jnp.dot(bh_ref[...], x_ref[...], preferred_element_type=jnp.float32)
    # W-direction box sum (== diff_y(cumsum_W(.), r)).  Cast the intermediate
    # back to the operand dtype (no-op for f32, bf16 MXU rate for bf16 models);
    # accumulate in f32.
    o_ref[...] = jnp.dot(
        y.astype(bw_ref.dtype), bw_ref[...],
        preferred_element_type=jnp.float32,
    ).astype(o_ref.dtype)


def _box_filter_call(xb, bh, bw, tile_h, single_buffer_bands, vmem_limit, cost):
    NC, H, W = xb.shape
    n_row_tiles = H // tile_h
    grid = (NC, n_row_tiles)

    # Single-buffer only operands whose block index never changes across the
    # grid (B_W always; B_H only when there is a single row tile).
    def band_spec(shape, index_map, single):
        if single:
            return pl.BlockSpec(shape, index_map, pipeline_mode=pl.Buffered(1))
        return pl.BlockSpec(shape, index_map)

    in_specs = [
        # Full image, invariant across the row-tile axis -> fetched once per b.
        pl.BlockSpec((None, H, W), lambda b, i: (b, 0, 0)),
        band_spec((tile_h, H), lambda b, i: (i, 0),
                  single_buffer_bands and n_row_tiles == 1),
        band_spec((W, W), lambda b, i: (0, 0), single_buffer_bands),
    ]
    out_specs = pl.BlockSpec((None, tile_h, W), lambda b, i: (b, i, 0))

    return pl.pallas_call(
        _box_filter_kernel,
        out_shape=jax.ShapeDtypeStruct((NC, H, W), xb.dtype),
        grid=grid,
        in_specs=in_specs,
        out_specs=out_specs,
        compiler_params=pltpu.CompilerParams(
            dimension_semantics=("parallel", "arbitrary"),
            vmem_limit_bytes=vmem_limit,
        ),
        cost_estimate=cost,
    )(xb, bh, bw)


def box_filter(x, r, *, tile_h=None):
    """Equivalent of BoxFilter(r).forward(x) for NCHW input."""
    N, C, H, W = x.shape
    # Same validity constraint as the torch slicing in diff_x / diff_y.
    assert H > 2 * r + 1 and W > 2 * r + 1, (H, W, r)

    # Row-tile size: whole image for moderate H; 512-row tiles for very tall
    # images (sized so double-buffered blocks stay well under v7x's 64 MiB).
    if tile_h is None:
        tile_h = H if H <= 512 else 512
    if tile_h > H or H % tile_h != 0 or (tile_h != H and tile_h % 8 != 0):
        tile_h = H
    n_row_tiles = H // tile_h

    compute_dtype = x.dtype  # 0/1 bands are exact in bf16 and f32 alike.
    bh = _band_matrix(H, r, compute_dtype)   # (H, H)
    bw = _band_matrix(W, r, compute_dtype)   # (W, W)

    xb = x.reshape(N * C, H, W)              # free row-major collapse

    x_isz = x.dtype.itemsize
    b_isz = jnp.dtype(compute_dtype).itemsize

    # Explicit VMEM budget derived from the actual block sizes (with headroom
    # for double buffering) so undersized default scoped limits (16 MiB on
    # v5e) never force smaller tiles, while staying far below v7x's 64 MiB.
    x_blk = H * W * x_isz
    out_blk = tile_h * W * x_isz
    bh_blk = tile_h * H * b_isz
    bw_blk = W * W * b_isz
    needed = 2 * x_blk + 2 * out_blk + 2 * bh_blk + bw_blk
    vmem_limit = int(min(max(4 * needed, 4 << 20), 48 << 20))

    # Advisory cost model: two matmuls per image, 2 flops per MAC.
    flops = 2 * N * C * (H * H * W + H * W * W)
    bytes_accessed = (2 * N * C * H * W * x_isz
                      + H * H * b_isz + W * W * b_isz)
    cost = pl.CostEstimate(
        flops=flops, transcendentals=0, bytes_accessed=bytes_accessed)

    try:
        out = _box_filter_call(xb, bh, bw, tile_h, True, vmem_limit, cost)
    except Exception:
        # pipeline_mode=pl.Buffered(1) not supported by this jax build; the
        # default double-buffered specs are functionally identical.
        out = _box_filter_call(xb, bh, bw, tile_h, False, vmem_limit, cost)

    return out.reshape(N, C, H, W)


# ---------------------------------------------------------------------------
# Pure-JAX literal translation of the PyTorch module (correctness reference).
# ---------------------------------------------------------------------------
def _diff_x(t, r):
    left = t[:, :, r:2 * r + 1]
    middle = t[:, :, 2 * r + 1:] - t[:, :, :-2 * r - 1]
    right = t[:, :, -1:] - t[:, :, -2 * r - 1:-r - 1]
    return jnp.concatenate([left, middle, right], axis=2)


def _diff_y(t, r):
    left = t[:, :, :, r:2 * r + 1]
    middle = t[:, :, :, 2 * r + 1:] - t[:, :, :, :-2 * r - 1]
    right = t[:, :, :, -1:] - t[:, :, :, -2 * r - 1:-r - 1]
    return jnp.concatenate([left, middle, right], axis=3)


def _reference_forward(x, r):
    return _diff_y(jnp.cumsum(_diff_x(jnp.cumsum(x, axis=2), r), axis=3), r)


if __name__ == "__main__":
    key = jax.random.PRNGKey(0)

    # Small shapes consistent with the module: batch=2, channels=4, 16x16, r=3.
    N, C, H, W, r = 2, 4, 16, 16, 3
    x = jax.random.normal(key, (N, C, H, W), dtype=jnp.float32)

    out = jax.block_until_ready(box_filter(x, r))
    ref = jax.block_until_ready(_reference_forward(x, r))

    assert out.shape == (N, C, H, W), out.shape
    # Tolerance accounts for the different (but mathematically identical)
    # summation order: direct band sums vs. cumsum-then-difference in f32.
    assert jnp.allclose(out, ref, atol=1e-3, rtol=1e-4), (
        "mismatch vs reference, max abs diff = "
        f"{float(jnp.max(jnp.abs(out - ref)))}")
    print("KERNEL_OK")
</pallas_src>

<mosaic_0001>
module attributes {stable_mosaic.version = 11 : i64} {
  func.func @_box_filter_kernel(%arg0: i32, %arg1: i32, %arg2: memref<1x16x16xf32, #tpu.memory_space<vmem>>, %arg3: memref<16x16xf32, #tpu.memory_space<vmem>>, %arg4: memref<16x16xf32, #tpu.memory_space<vmem>>, %arg5: memref<1x16x16xf32, #tpu.memory_space<vmem>>) attributes {dimension_semantics = [#tpu.dimension_semantics<parallel>, #tpu.dimension_semantics<arbitrary>], iteration_bounds = array<i64: 8, 1>, scalar_prefetch = 0 : i64, scratch_operands = 0 : i64, tpu.core_type = #tpu.core_type<tc>, window_params = [{transform_indices = @transform_0, window_bounds = array<i64: 1, 16, 16>}, {pipeline_mode = #tpu.pipeline_mode<synchronous>, transform_indices = @transform_1, window_bounds = array<i64: 16, 16>}, {pipeline_mode = #tpu.pipeline_mode<synchronous>, transform_indices = @transform_2, window_bounds = array<i64: 16, 16>}, {transform_indices = @transform_3, window_bounds = array<i64: 1, 16, 16>}]} {
    %c0 = arith.constant 0 : index
    %c0_0 = arith.constant 0 : index
    %0 = vector.load %arg3[%c0, %c0_0] : memref<16x16xf32, #tpu.memory_space<vmem>>, vector<16x16xf32>
    %c0_1 = arith.constant 0 : index
    %c0_2 = arith.constant 0 : index
    %c0_3 = arith.constant 0 : index
    %1 = vector.load %arg2[%c0_1, %c0_2, %c0_3] : memref<1x16x16xf32, #tpu.memory_space<vmem>>, vector<1x16x16xf32>
    %2 = vector.shape_cast %1 : vector<1x16x16xf32> to vector<16x16xf32>
    %cst = arith.constant dense<0.000000e+00> : vector<16x16xf32>
    %3 = tpu.matmul %0, %2, %cst {dimension_numbers = #tpu.dot_dimension_numbers<[1], [0], [0], [1], [0, 0, 1, 1], [], []>} : vector<16x16xf32>, vector<16x16xf32>, vector<16x16xf32> -> vector<16x16xf32>
    %c0_4 = arith.constant 0 : index
    %c0_5 = arith.constant 0 : index
    %4 = vector.load %arg4[%c0_4, %c0_5] : memref<16x16xf32, #tpu.memory_space<vmem>>, vector<16x16xf32>
    %cst_6 = arith.constant dense<0.000000e+00> : vector<16x16xf32>
    %5 = tpu.matmul %3, %4, %cst_6 {dimension_numbers = #tpu.dot_dimension_numbers<[1], [0], [0], [1], [0, 0, 1, 1], [], []>} : vector<16x16xf32>, vector<16x16xf32>, vector<16x16xf32> -> vector<16x16xf32>
    %c0_7 = arith.constant 0 : index
    %c0_8 = arith.constant 0 : index
    %c0_9 = arith.constant 0 : index
    %6 = vector.load %arg5[%c0_7, %c0_8, %c0_9] : memref<1x16x16xf32, #tpu.memory_space<vmem>>, vector<1x16x16xf32>
    %7 = vector.shape_cast %6 : vector<1x16x16xf32> to vector<16x16xf32>
    %8 = vector.shape_cast %5 : vector<16x16xf32> to vector<1x16x16xf32>
    tpu.vector_store %arg5[%c0_7, %c0_8, %c0_9], %8 {strides = array<i32>} : memref<1x16x16xf32, #tpu.memory_space<vmem>>, vector<1x16x16xf32>,
    return
  }
  func.func @transform_0(%arg0: i32, %arg1: i32) -> (i32, i32, i32) {
    %c0_i32 = arith.constant 0 : i32
    %c0_i32_0 = arith.constant 0 : i32
    %c0_i32_1 = arith.constant 0 : i32
    return %arg0, %c0_i32, %c0_i32_0 : i32, i32, i32
  }
  func.func @transform_1(%arg0: i32, %arg1: i32) -> (i32, i32) {
    %c0_i32 = arith.constant 0 : i32
    %c0_i32_0 = arith.constant 0 : i32
    return %arg1, %c0_i32 : i32, i32
  }
  func.func @transform_2(%arg0: i32, %arg1: i32) -> (i32, i32) {
    %c0_i32 = arith.constant 0 : i32
    %c0_i32_0 = arith.constant 0 : i32
    %c0_i32_1 = arith.constant 0 : i32
    return %c0_i32, %c0_i32_0 : i32, i32
  }
  func.func @transform_3(%arg0: i32, %arg1: i32) -> (i32, i32, i32) {
    %c0_i32 = arith.constant 0 : i32
    %c0_i32_0 = arith.constant 0 : i32
    return %arg0, %arg1, %c0_i32 : i32, i32, i32
  }
}

module attributes {stable_mosaic.version = 11 : i64} {
  func.func @_box_filter_kernel(%arg0: i32, %arg1: i32, %arg2: memref<1x16x16xf32, #tpu.memory_space<vmem>>, %arg3: memref<16x16xf32, #tpu.memory_space<vmem>>, %arg4: memref<16x16xf32, #tpu.memory_space<vmem>>, %arg5: memref<1x16x16xf32, #tpu.memory_space<vmem>>) attributes {dimension_semantics = [#tpu.dimension_semantics<parallel>, #tpu.dimension_semantics<arbitrary>], iteration_bounds = array<i64: 8, 1>, scalar_prefetch = 0 : i64, scratch_operands = 0 : i64, tpu.core_type = #tpu.core_type<tc>, window_params = [{transform_indices = @transform_0, window_bounds = array<i64: 1, 16, 16>}, {transform_indices = @transform_1, window_bounds = array<i64: 16, 16>}, {pipeline_mode = #tpu.pipeline_mode<synchronous>, transform_indices = @transform_2, window_bounds = array<i64: 16, 16>}, {transform_indices = @transform_3, window_bounds = array<i64: 1, 16, 16>}]} {
    %c0 = arith.constant 0 : index
    %c0_0 = arith.constant 0 : index
    %0 = vector.load %arg3[%c0, %c0_0] : memref<16x16xf32, #tpu.memory_space<vmem>>, vector<16x16xf32>
    %c0_1 = arith.constant 0 : index
    %c0_2 = arith.constant 0 : index
    %c0_3 = arith.constant 0 : index
    %1 = vector.load %arg2[%c0_1, %c0_2, %c0_3] : memref<1x16x16xf32, #tpu.memory_space<vmem>>, vector<1x16x16xf32>
    %2 = vector.shape_cast %1 : vector<1x16x16xf32> to vector<16x16xf32>
    %cst = arith.constant dense<0.000000e+00> : vector<16x16xf32>
    %3 = tpu.matmul %0, %2, %cst {dimension_numbers = #tpu.dot_dimension_numbers<[1], [0], [0], [1], [0, 0, 1, 1], [], []>} : vector<16x16xf32>, vector<16x16xf32>, vector<16x16xf32> -> vector<16x16xf32>
    %c0_4 = arith.constant 0 : index
    %c0_5 = arith.constant 0 : index
    %4 = vector.load %arg4[%c0_4, %c0_5] : memref<16x16xf32, #tpu.memory_space<vmem>>, vector<16x16xf32>
    %cst_6 = arith.constant dense<0.000000e+00> : vector<16x16xf32>
    %5 = tpu.matmul %3, %4, %cst_6 {dimension_numbers = #tpu.dot_dimension_numbers<[1], [0], [0], [1], [0, 0, 1, 1], [], []>} : vector<16x16xf32>, vector<16x16xf32>, vector<16x16xf32> -> vector<16x16xf32>
    %c0_7 = arith.constant 0 : index
    %c0_8 = arith.constant 0 : index
    %c0_9 = arith.constant 0 : index
    %6 = vector.load %arg5[%c0_7, %c0_8, %c0_9] : memref<1x16x16xf32, #tpu.memory_space<vmem>>, vector<1x16x16xf32>
    %7 = vector.shape_cast %6 : vector<1x16x16xf32> to vector<16x16xf32>
    %8 = vector.shape_cast %5 : vector<16x16xf32> to vector<1x16x16xf32>
    tpu.vector_store %arg5[%c0_7, %c0_8, %c0_9], %8 {strides = array<i32>} : memref<1x16x16xf32, #tpu.memory_space<vmem>>, vector<1x16x16xf32>,
    return
  }
  func.func @transform_0(%arg0: i32, %arg1: i32) -> (i32, i32, i32) {
    %c0_i32 = arith.constant 0 : i32
    %c0_i32_0 = arith.constant 0 : i32
    %c0_i32_1 = arith.constant 0 : i32
    return %arg0, %c0_i32, %c0_i32_0 : i32, i32, i32
  }
  func.func @transform_1(%arg0: i32, %arg1: i32) -> (i32, i32) {
    %c0_i32 = arith.constant 0 : i32
    %c0_i32_0 = arith.constant 0 : i32
    return %arg1, %c0_i32 : i32, i32
  }
  func.func @transform_2(%arg0: i32, %arg1: i32) -> (i32, i32) {
    %c0_i32 = arith.constant 0 : i32
    %c0_i32_0 = arith.constant 0 : i32
    %c0_i32_1 = arith.constant 0 : i32
    return %c0_i32, %c0_i32_0 : i32, i32
  }
  func.func @transform_3(%arg0: i32, %arg1: i32) -> (i32, i32, i32) {
    %c0_i32 = arith.constant 0 : i32
    %c0_i32_0 = arith.constant 0 : i32
    return %arg0, %arg1, %c0_i32 : i32, i32, i32
  }
}

</mosaic_0001>

<bundles_post_ra>
// kernel: tpu_custom_call.1
= control target key start
LH: loop header
LB: loop body
LE: loop exit
PB: predicated region body
PF: predicated region fallthrough
CT: control target
= control target key end

     0   :  { %8 = vsyncpa [#allocation3], 0  ;;  %s917_s0 = inlined_call_operand.hbm [shape: f32[8,16,16], index: 0, kind: input, shape index: {}]   ;;  %s918_s1 = inlined_call_operand.hbm [shape: f32[16,16], index: 1, kind: input, shape index: {}]   ;;  %s919_s2 = inlined_call_operand.hbm [shape: f32[16,16], index: 2, kind: input, shape index: {}]   ;;  %s920_s3 = inlined_call_operand.hbm [shape: f32[8,16,16], index: 3, kind: output, shape index: {}]  }
   0x1   :  { %10 = vsyncpa [#allocation3 + $0x1], 0 }
   0x2   :  { %11 = vsyncpa [#allocation6], 0 }
   0x3   :  { %12 = vsyncpa [#allocation4], 0 }
   0x4   :  { %14 = vsyncpa [#allocation4 + $0x1], 0  ;;  %s758_s12 = smov 0   ;;  %s760_s13 = smov 0  }
   0x5   :  { %s762_s14 = smov 0   ;;  %s764_s15 = smov 0  }
   0x6   :  { %s766_s16 = smov 0   ;;  %s768_s17 = smov 0  }
   0x7 LB: > { %s438_s18 = sadd.s32 4294967295, %s730_s17   ;;  %s439_s19 = sadd.s32 4294967294, %s730_s17   ;;  %s730_s17 = sphi %s768_s17, %s20_s17   ;;  %s726_s16 = sphi %s766_s16, %s930_s16   ;;  %s722_s15 = sphi %s764_s15, %s929_s15   ;;  %s718_s14 = sphi %s762_s14, %s928_s14   ;;  %s714_s13 = sphi %s760_s13, %s927_s13   ;;  %s710_s12 = sphi %s758_s12, %s926_s12  }
   0x8   : > { %p52_p0 = scmp.ne.s32.totalorder %s714_s13, %s710_s12  ;;  %p794_p1 = scmp.eq.s32.totalorder %s438_s18, 0 }
   0x9   : > { %p131_p2 = scmp.eq.s32.totalorder %s439_s19, 7  ;;  %p440_p4 = scmp.ge.s32.totalorder %s730_s17, 1 }
   0xa   : > { %p800_p3 = por %p794_p1, %p52_p0  ;;  %p138_p6 = scmp.lt.s32.totalorder %s730_s17, 9 }
   0xb   : > { %p805_p5 = por %p131_p2, %p52_p0  ;;  %s152_s25 = sshll.u32 %s918_s1, 4  ;;  %s153_s25 = int_to_ptr.hbm [resolvable:$true] %s152_s25 }
   0xc   : > { %p813_p7 = pnand %p440_p4, %p138_p6  ;;  %s732_s27 = smov [#allocation5]  }
   0xd   : > { %s154_s28 = sshll.u32 %s732_s27, 4  ;;  %s166_s4 = sshll.u32 %s919_s2, 4  ;;  %s155_s28 = int_to_ptr.vmem [resolvable:$true] %s154_s28  ;;  %s167_s4 = int_to_ptr.hbm [resolvable:$true] %s166_s4 }
   0xe   : > { %p479_p8 = pneg %p813_p7  ;;  %s733_s5 = smov 128  }
   0xf   : > { %s734_s6 = smov 8   ;;  %s735_s7 = smov [#allocation7]  }
  0x10   : > { %p480_p9 = pnand %p479_p8, %p794_p1  ;;  %s168_s8 = sshll.u32 %s735_s7, 4  ;;  %s169_s8 = int_to_ptr.vmem [resolvable:$true] %s168_s8 }
  0x11   : > { %p125_p10 = scmp.eq.s32.totalorder %s438_s18, 7  ;;  %s32_s9 = sadd.s32 1, %s726_s16 }
  0x12   : > { %482 = dma.hbm_to_vmem [thread:$0]  (!%p480_p9), %s153_s25, 256, %s155_s28, [#allocation6], %s733_s5, %s733_s5, %s734_s6  }
  0x13   : > { %485 = dma.hbm_to_vmem [thread:$0]  (!%p480_p9), %s167_s4, 256, %s169_s8, [#allocation6], %s733_s5, %s733_s5, %s734_s6  }
  0x14   : > { %p34_p11 = scmp.ge.s32.totalorder %s32_s9, 8  ;;  %s39_s10 = sadd.s32 1, %s718_s14 }
  0x15   : > { %p46_p12 = scmp.ne.s32.totalorder %s718_s14, %s714_s13  ;;  %p47_p13 = scmp.eq.s32.totalorder %s730_s17, 0 }
  0x16   : > { %s932_s9 = smov (%p34_p11, %s32_s9), 0  ;;  %p496_p2 = scmp.lt.s32.totalorder %s730_s17, 8 }
  0x17   : > { %p839_p0 = por %p125_p10, %p46_p12  ;;  %s36_s19 = ssub.s32 %s726_s16, %s932_s9 }
  0x18   : > { %s182_s23 = sand.u32 1, %s718_s14   ;;  %p37_p4 = scmp.eq.s32.totalorder %s36_s19, 0 }
  0x19   : > { %p48_p6 = por %p47_p13, %p46_p12  ;;  %s444_s24 = sshll.u32 %s182_s23, 4 }
  0x1a   : > { %s461_s18 = sshll.u32 %s726_s16, 4  ;;  %s186_s4 = scalar_lea.vmem [#allocation2], %s444_s24 }
  0x1b   : > { %s849_s25 = scalar_select %p37_p4, %s718_s14, %s39_s10  }
  0x1c   : > { %s191_s29 = scalar_lea.hbm %s917_s0, %s461_s18  ;;  %s194_s7 = sshll.u32 %s186_s4, 4  ;;  %s195_s7 = int_to_ptr.vmem [resolvable:$true] %s194_s7 }
  0x1d   : > { %s192_s30 = sshll.u32 %s191_s29, 4  ;;  %p487_p8 = pnand %p496_p2, %p48_p6  ;;  %s193_s30 = int_to_ptr.hbm [resolvable:$true] %s192_s30 }
  0x1e   : > { %s183_s8 = scalar_lea.sflag [#allocation3], %s182_s23  ;;  %206 = sbr.rel (%p813_p7) target bundleno = 310 (0x136), region = 32 }
  0x1f   : > { %489 = dma.hbm_to_vmem [thread:$0]  (!%p487_p8), %s193_s30, 256, %s195_s7, %s183_s8, %s733_s5, %s733_s5, %s734_s6  }
  0x20   : > { %s862_s10 = sand.u32 (!%p813_p7), 1, %s714_s13  }
  0x21   : > { %s448_s19 = sshll.u32 (!%p813_p7), %s862_s10, 4  ;;  %s209_s24 = scalar_lea.sflag (!%p813_p7), [#allocation3], %s862_s10 }
  0x22   : > { %s212_s18 = scalar_lea.vmem (!%p813_p7), [#allocation2], %s448_s19 }
  0x23   : > { %697 = dma.done.wait (%p800_p3), %s209_s24, 256  }
  0x24   : > { %699 = vsyncadd (%p800_p3), %s209_s24, 4294967040 }
  0x25   : > { %701 = dma.done.wait (%p794_p1), [#allocation6], 512  }
  0x26   : > { %703 = vsyncadd (%p794_p1), [#allocation6], 4294966784  ;;  %v251_v0 = vld [vmem:[%s212_s18 + $0x8] sm:$0xff]  ;;  %v250_v1 = vld [vmem:[%s212_s18] sm:$0xff]  ;;  %vm252_vm0 = vcmask 130048   ;;  %s245_s20 = scalar_lea.vmem [#allocation8], %s448_s19 }
  0x27   : > { %463 = vmatpush.msra.mxu2 %v251_v0  ;;  %v249_v2 = vld [vmem:[#allocation5 + $0x8] sm:$0xff]  ;;  %273 = vmatpush.msra.mxu0 %v251_v0  ;;  %v248_v3 = vld [vmem:[#allocation5] sm:$0xff]  ;;  %v283_v4 = vld [vmem:[#allocation7 + $0x8] sm:$0xff]  ;;  %s462_s21 = sshll.u32 %s722_s15, 4  ;;  %s330_s23 = sshll.u32 %s245_s20, 4  ;;  %s331_s23 = int_to_ptr.vmem [resolvable:$true] %s330_s23 }
  0x28   : > { %465 = vmatpush.msra.mxu3 %v283_v4  ;;  %304 = vmatpush.msra.mxu1 %v283_v4  ;;  %v282_v5 = vld [vmem:[#allocation7] sm:$0xff]  ;;  %s329_s6 = scalar_lea.hbm %s920_s3, %s462_s21  ;;  %s316_s28 = scalar_lea.sflag [#allocation4], %s862_s10 }
  0x29   : > { %464 = vmatpush.msra.mxu2 %v250_v1  ;;  %274 = vmatpush.msra.mxu0 %v250_v1  ;;  %s332_s27 = sshll.u32 %s329_s6, 4  ;;  %s664_s7 = scalar_lea.hbm %s920_s3, 128  ;;  %s333_s27 = int_to_ptr.hbm [resolvable:$true] %s332_s27 }
  0x2a   : > { %453 = vmatmul.msk.f32.vlgmr.msra.gmra.mxu2 %vm252_vm0, %v249_v2  ;;  %452 = vmatmul.msk.f32.vlgmr.msra.gmra.mxu0 %vm252_vm0, %v248_v3  ;;  %s658_s29 = sshra.s32 %s333_s27, 4  ;;  %s659_s29 = int_to_ptr.hbm [resolvable:$true] %s658_s29 }
  0x2b   : > { %466 = vmatpush.msra.mxu3 %v282_v5  ;;  %305 = vmatpush.msra.mxu1 %v282_v5  ;;  %s660_s30 = scalar_lea.hbm %s659_s29, 16  ;;  %p665_p9 = scmp.lt.s32.totalorder %s659_s29, %s920_s3 }
  0x2c   : > { %p661_p1 = scmp.ne.s32.totalorder %s659_s29, %s660_s30  ;;  %p666_p10 = scmp.lt.s32.totalorder %s664_s7, %s660_s30 }
  0x2e   : > { %p662_p3 = pnand %p661_p1, %p839_p0  ;;  %p667_p11 = por %p666_p10, %p665_p9 }
  0x30   : > { %p663_p7 = pneg %p662_p3 }
  0x32   : > { %p668_p12 = pnand %p667_p11, %p663_p7 }
  0xa7   : > { %v276_v6 = vpop.f32.mrf.mxu0 }
  0xa8   : > { %454 = vmatmul.msk.f32.vlgmr.msra.gmra.mxu1 %vm252_vm0, %v276_v6 }
  0xad   : > { %v279_v7 = vpop.f32.mrf.mxu2 }
  0xae   : > { %455 = vmatmul.msk.f32.vlgmr.msra.gmra.mxu3 %vm252_vm0, %v279_v7 }
 0x125   : > { %v307_v8 = vpop.f32.mrf.mxu1 }
 0x126   : > { %313 = vst.msk [vmem:[%s245_s20] sm:$0xff] %vm252_vm0, %v307_v8 }
 0x131   : > { %v310_v9 = vpop.f32.mrf.mxu3 }
 0x132   : > { %314 = vst.msk [vmem:[%s245_s20 + $0x8] sm:$0xff] %vm252_vm0, %v310_v9 }
 0x133   : > { %671 = shalt.err (!%p668_p12)
}
 0x134   : > { %s736_s10 = smov 128   ;;  %s737_s24 = smov 8  }
 0x135   : > { %477 = dma.vmem_to_hbm [thread:$0]  (%p839_p0), %s331_s23, 256, %s333_s27, %s316_s28, %s736_s10, %s736_s10, %s737_s24  }
 0x136 PF: > { %p499_p13 = scmp.ge.s32.totalorder %s730_s17, 2  ;;  %s347_s18 = sand.u32 1, %s710_s12  }
 0x137   : > { %s348_s20 = scalar_lea.sflag [#allocation4], %s347_s18 }
 0x138   : > { %p491_p2 = pnand %p499_p13, %p805_p5 }
 0x13a   : > { %p492_p4 = pneg %p491_p2 }
 0x13c   : > { %705 = dma.done.wait (%p492_p4), %s348_s20, 256  }
 0x13d   : > { %707 = vsyncadd (%p492_p4), %s348_s20, 4294967040  ;;  %s20_s17 = sadd.s32 1, %s730_s17   ;;  %s926_s12 = smov %s714_s13 }
 0x13e   : > { %p17_p6 = scmp.ge.s32.totalorder %s20_s17, 10   ;;  %s927_s13 = smov %s718_s14 }
 0x13f   : > { %s928_s14 = smov %s849_s25  ;;  %s929_s15 = smov %s726_s16 }
 0x140   : > { %s930_s16 = smov %s932_s9  ;;  %19 = sbr.rel (!%p17_p6) target bundleno = 7 (0x7), region = 86 }
 0x145   :  { %354 = vsyncpa [#allocation3], 1 }
 0x146   :  { %356 = vsyncpa [#allocation3 + $0x1], 1 }
 0x147   :  { %357 = vsyncpa [#allocation6], 1 }
 0x148   :  { %358 = vsyncpa [#allocation4], 1 }
 0x149   :  { %360 = vsyncpa [#allocation4 + $0x1], 1 }

// kernel: tpu_custom_call.1
= control target key start
LH: loop header
LB: loop body
LE: loop exit
PB: predicated region body
PF: predicated region fallthrough
CT: control target
= control target key end

     0   :  { %8 = vsyncpa [#allocation3], 0  ;;  %s917_s0 = inlined_call_operand.hbm [shape: f32[8,16,16], index: 0, kind: input, shape index: {}]   ;;  %s918_s1 = inlined_call_operand.hbm [shape: f32[16,16], index: 1, kind: input, shape index: {}]   ;;  %s919_s2 = inlined_call_operand.hbm [shape: f32[16,16], index: 2, kind: input, shape index: {}]   ;;  %s920_s3 = inlined_call_operand.hbm [shape: f32[8,16,16], index: 3, kind: output, shape index: {}]  }
   0x1   :  { %10 = vsyncpa [#allocation3 + $0x1], 0 }
   0x2   :  { %11 = vsyncpa [#allocation6], 0 }
   0x3   :  { %12 = vsyncpa [#allocation4], 0 }
   0x4   :  { %14 = vsyncpa [#allocation4 + $0x1], 0  ;;  %s758_s12 = smov 0   ;;  %s760_s13 = smov 0  }
   0x5   :  { %s762_s14 = smov 0   ;;  %s764_s15 = smov 0  }
   0x6   :  { %s766_s16 = smov 0   ;;  %s768_s17 = smov 0  }
   0x7 LB: > { %s438_s18 = sadd.s32 4294967295, %s730_s17   ;;  %s439_s19 = sadd.s32 4294967294, %s730_s17   ;;  %s730_s17 = sphi %s768_s17, %s20_s17   ;;  %s726_s16 = sphi %s766_s16, %s930_s16   ;;  %s722_s15 = sphi %s764_s15, %s929_s15   ;;  %s718_s14 = sphi %s762_s14, %s928_s14   ;;  %s714_s13 = sphi %s760_s13, %s927_s13   ;;  %s710_s12 = sphi %s758_s12, %s926_s12  }
   0x8   : > { %p52_p0 = scmp.ne.s32.totalorder %s714_s13, %s710_s12  ;;  %p794_p1 = scmp.eq.s32.totalorder %s438_s18, 0 }
   0x9   : > { %p131_p2 = scmp.eq.s32.totalorder %s439_s19, 7  ;;  %p440_p4 = scmp.ge.s32.totalorder %s730_s17, 1 }
   0xa   : > { %p800_p3 = por %p794_p1, %p52_p0  ;;  %p138_p6 = scmp.lt.s32.totalorder %s730_s17, 9 }
   0xb   : > { %p805_p5 = por %p131_p2, %p52_p0  ;;  %s152_s25 = sshll.u32 %s918_s1, 4  ;;  %s153_s25 = int_to_ptr.hbm [resolvable:$true] %s152_s25 }
   0xc   : > { %p813_p7 = pnand %p440_p4, %p138_p6  ;;  %s732_s27 = smov [#allocation5]  }
   0xd   : > { %s154_s28 = sshll.u32 %s732_s27, 4  ;;  %s166_s4 = sshll.u32 %s919_s2, 4  ;;  %s155_s28 = int_to_ptr.vmem [resolvable:$true] %s154_s28  ;;  %s167_s4 = int_to_ptr.hbm [resolvable:$true] %s166_s4 }
   0xe   : > { %p479_p8 = pneg %p813_p7  ;;  %s733_s5 = smov 128  }
   0xf   : > { %s734_s6 = smov 8   ;;  %s735_s7 = smov [#allocation7]  }
  0x10   : > { %p480_p9 = pnand %p479_p8, %p794_p1  ;;  %s168_s8 = sshll.u32 %s735_s7, 4  ;;  %s169_s8 = int_to_ptr.vmem [resolvable:$true] %s168_s8 }
  0x11   : > { %p125_p10 = scmp.eq.s32.totalorder %s438_s18, 7  ;;  %s32_s9 = sadd.s32 1, %s726_s16 }
  0x12   : > { %482 = dma.hbm_to_vmem [thread:$0]  (!%p480_p9), %s153_s25, 256, %s155_s28, [#allocation6], %s733_s5, %s733_s5, %s734_s6  }
  0x13   : > { %485 = dma.hbm_to_vmem [thread:$0]  (!%p480_p9), %s167_s4, 256, %s169_s8, [#allocation6], %s733_s5, %s733_s5, %s734_s6  }
  0x14   : > { %p34_p11 = scmp.ge.s32.totalorder %s32_s9, 8  ;;  %s39_s10 = sadd.s32 1, %s718_s14 }
  0x15   : > { %p46_p12 = scmp.ne.s32.totalorder %s718_s14, %s714_s13  ;;  %p47_p13 = scmp.eq.s32.totalorder %s730_s17, 0 }
  0x16   : > { %s932_s9 = smov (%p34_p11, %s32_s9), 0  ;;  %p496_p2 = scmp.lt.s32.totalorder %s730_s17, 8 }
  0x17   : > { %p839_p0 = por %p125_p10, %p46_p12  ;;  %s36_s19 = ssub.s32 %s726_s16, %s932_s9 }
  0x18   : > { %s182_s23 = sand.u32 1, %s718_s14   ;;  %p37_p4 = scmp.eq.s32.totalorder %s36_s19, 0 }
  0x19   : > { %p48_p6 = por %p47_p13, %p46_p12  ;;  %s444_s24 = sshll.u32 %s182_s23, 4 }
  0x1a   : > { %s461_s18 = sshll.u32 %s726_s16, 4  ;;  %s186_s4 = scalar_lea.vmem [#allocation2], %s444_s24 }
  0x1b   : > { %s849_s25 = scalar_select %p37_p4, %s718_s14, %s39_s10  }
  0x1c   : > { %s191_s29 = scalar_lea.hbm %s917_s0, %s461_s18  ;;  %s194_s7 = sshll.u32 %s186_s4, 4  ;;  %s195_s7 = int_to_ptr.vmem [resolvable:$true] %s194_s7 }
  0x1d   : > { %s192_s30 = sshll.u32 %s191_s29, 4  ;;  %p487_p8 = pnand %p496_p2, %p48_p6  ;;  %s193_s30 = int_to_ptr.hbm [resolvable:$true] %s192_s30 }
  0x1e   : > { %s183_s8 = scalar_lea.sflag [#allocation3], %s182_s23  ;;  %206 = sbr.rel (%p813_p7) target bundleno = 310 (0x136), region = 32 }
  0x1f   : > { %489 = dma.hbm_to_vmem [thread:$0]  (!%p487_p8), %s193_s30, 256, %s195_s7, %s183_s8, %s733_s5, %s733_s5, %s734_s6  }
  0x20   : > { %s862_s10 = sand.u32 (!%p813_p7), 1, %s714_s13  }
  0x21   : > { %s448_s19 = sshll.u32 (!%p813_p7), %s862_s10, 4  ;;  %s209_s24 = scalar_lea.sflag (!%p813_p7), [#allocation3], %s862_s10 }
  0x22   : > { %s212_s18 = scalar_lea.vmem (!%p813_p7), [#allocation2], %s448_s19 }
  0x23   : > { %697 = dma.done.wait (%p800_p3), %s209_s24, 256  }
  0x24   : > { %699 = vsyncadd (%p800_p3), %s209_s24, 4294967040 }
  0x25   : > { %701 = dma.done.wait (%p794_p1), [#allocation6], 512  }
  0x26   : > { %703 = vsyncadd (%p794_p1), [#allocation6], 4294966784  ;;  %v251_v0 = vld [vmem:[%s212_s18 + $0x8] sm:$0xff]  ;;  %v250_v1 = vld [vmem:[%s212_s18] sm:$0xff]  ;;  %vm252_vm0 = vcmask 130048   ;;  %s245_s20 = scalar_lea.vmem [#allocation8], %s448_s19 }
  0x27   : > { %463 = vmatpush.msra.mxu2 %v251_v0  ;;  %v249_v2 = vld [vmem:[#allocation5 + $0x8] sm:$0xff]  ;;  %273 = vmatpush.msra.mxu0 %v251_v0  ;;  %v248_v3 = vld [vmem:[#allocation5] sm:$0xff]  ;;  %v283_v4 = vld [vmem:[#allocation7 + $0x8] sm:$0xff]  ;;  %s462_s21 = sshll.u32 %s722_s15, 4  ;;  %s330_s23 = sshll.u32 %s245_s20, 4  ;;  %s331_s23 = int_to_ptr.vmem [resolvable:$true] %s330_s23 }
  0x28   : > { %465 = vmatpush.msra.mxu3 %v283_v4  ;;  %304 = vmatpush.msra.mxu1 %v283_v4  ;;  %v282_v5 = vld [vmem:[#allocation7] sm:$0xff]  ;;  %s329_s6 = scalar_lea.hbm %s920_s3, %s462_s21  ;;  %s316_s28 = scalar_lea.sflag [#allocation4], %s862_s10 }
  0x29   : > { %464 = vmatpush.msra.mxu2 %v250_v1  ;;  %274 = vmatpush.msra.mxu0 %v250_v1  ;;  %s332_s27 = sshll.u32 %s329_s6, 4  ;;  %s664_s7 = scalar_lea.hbm %s920_s3, 128  ;;  %s333_s27 = int_to_ptr.hbm [resolvable:$true] %s332_s27 }
  0x2a   : > { %453 = vmatmul.msk.f32.vlgmr.msra.gmra.mxu2 %vm252_vm0, %v249_v2  ;;  %452 = vmatmul.msk.f32.vlgmr.msra.gmra.mxu0 %vm252_vm0, %v248_v3  ;;  %s658_s29 = sshra.s32 %s333_s27, 4  ;;  %s659_s29 = int_to_ptr.hbm [resolvable:$true] %s658_s29 }
  0x2b   : > { %466 = vmatpush.msra.mxu3 %v282_v5  ;;  %305 = vmatpush.msra.mxu1 %v282_v5  ;;  %s660_s30 = scalar_lea.hbm %s659_s29, 16  ;;  %p665_p9 = scmp.lt.s32.totalorder %s659_s29, %s920_s3 }
  0x2c   : > { %p661_p1 = scmp.ne.s32.totalorder %s659_s29, %s660_s30  ;;  %p666_p10 = scmp.lt.s32.totalorder %s664_s7, %s660_s30 }
  0x2e   : > { %p662_p3 = pnand %p661_p1, %p839_p0  ;;  %p667_p11 = por %p666_p10, %p665_p9 }
  0x30   : > { %p663_p7 = pneg %p662_p3 }
  0x32   : > { %p668_p12 = pnand %p667_p11, %p663_p7 }
  0xa7   : > { %v276_v6 = vpop.f32.mrf.mxu0 }
  0xa8   : > { %454 = vmatmul.msk.f32.vlgmr.msra.gmra.mxu1 %vm252_vm0, %v276_v6 }
  0xad   : > { %v279_v7 = vpop.f32.mrf.mxu2 }
  0xae   : > { %455 = vmatmul.msk.f32.vlgmr.msra.gmra.mxu3 %vm252_vm0, %v279_v7 }
 0x125   : > { %v307_v8 = vpop.f32.mrf.mxu1 }
 0x126   : > { %313 = vst.msk [vmem:[%s245_s20] sm:$0xff] %vm252_vm0, %v307_v8 }
 0x131   : > { %v310_v9 = vpop.f32.mrf.mxu3 }
 0x132   : > { %314 = vst.msk [vmem:[%s245_s20 + $0x8] sm:$0xff] %vm252_vm0, %v310_v9 }
 0x133   : > { %671 = shalt.err (!%p668_p12)
}
 0x134   : > { %s736_s10 = smov 128   ;;  %s737_s24 = smov 8  }
 0x135   : > { %477 = dma.vmem_to_hbm [thread:$0]  (%p839_p0), %s331_s23, 256, %s333_s27, %s316_s28, %s736_s10, %s736_s10, %s737_s24  }
 0x136 PF: > { %p499_p13 = scmp.ge.s32.totalorder %s730_s17, 2  ;;  %s347_s18 = sand.u32 1, %s710_s12  }
 0x137   : > { %s348_s20 = scalar_lea.sflag [#allocation4], %s347_s18 }
 0x138   : > { %p491_p2 = pnand %p499_p13, %p805_p5 }
 0x13a   : > { %p492_p4 = pneg %p491_p2 }
 0x13c   : > { %705 = dma.done.wait (%p492_p4), %s348_s20, 256  }
 0x13d   : > { %707 = vsyncadd (%p492_p4), %s348_s20, 4294967040  ;;  %s20_s17 = sadd.s32 1, %s730_s17   ;;  %s926_s12 = smov %s714_s13 }
 0x13e   : > { %p17_p6 = scmp.ge.s32.totalorder %s20_s17, 10   ;;  %s927_s13 = smov %s718_s14 }
 0x13f   : > { %s928_s14 = smov %s849_s25  ;;  %s929_s15 = smov %s726_s16 }
 0x140   : > { %s930_s16 = smov %s932_s9  ;;  %19 = sbr.rel (!%p17_p6) target bundleno = 7 (0x7), region = 86 }
 0x145   :  { %354 = vsyncpa [#allocation3], 1 }
 0x146   :  { %356 = vsyncpa [#allocation3 + $0x1], 1 }
 0x147   :  { %357 = vsyncpa [#allocation6], 1 }
 0x148   :  { %358 = vsyncpa [#allocation4], 1 }
 0x149   :  { %360 = vsyncpa [#allocation4 + $0x1], 1 }

</bundles_post_ra>
